<compile_context>
chip_gen: v5e
topology: v5e:2x2
jax: 0.10.0
libtpu: 0.0.40
codegen_flags: <defaults>
</compile_context>

<pallas_src>
import jax
import jax.numpy as jnp
from jax.experimental import pallas as pl
from jax.experimental.pallas import tpu as pltpu

LANES = 128
SUBLANES = 8
# Target bytes of each input stream moved per grid step (see header comment).
BYTES_PER_STREAM = 8 * 1024 * 1024


def _round_up(n, m):
    return ((n + m - 1) // m) * m


def _num_tensorcores():
    """TensorCores per chip: 2 on v7x, 1 on v5e/v6e (safe default 1)."""
    try:
        kind = jax.devices()[0].device_kind.lower()
    except Exception:
        return 1
    return 2 if "v7" in kind else 1


def _make_ssd_kernel(tile_rows, num_blocks, valid_rows_last, have_dupes):
    """Sum-of-squared-differences reduction over (tile_rows, 128) blocks."""
    partial_last = valid_rows_last != tile_rows
    # Blocks with blk < full_upto are guaranteed fully in-bounds.
    full_upto = num_blocks - 1 if partial_last else num_blocks
    plain = (not partial_last) and (not have_dupes)

    def reduce_to_slab(v):
        # (tile_rows,128) -> (8,128): the reshape groups whole native (8,128)
        # tiles, so this lowers to pure vreg adds (no cross-lane relayout).
        return v.reshape(tile_rows // SUBLANES, SUBLANES, LANES).sum(axis=0)

    def kernel(x_ref, t_ref, loss_ref):
        c = pl.program_id(0)            # core / parallel axis
        i = pl.program_id(1)            # reduction step (arbitrary axis)
        n_i = pl.num_programs(1)
        blk = c * n_i + i               # logical block index

        @pl.when(i == 0)
        def _():
            # Output block is resident across the reduction axis (its
            # index_map ignores i), so it doubles as the accumulator.
            loss_ref[0] = jnp.zeros((SUBLANES, LANES), jnp.float32)

        # Cast to f32 BEFORE subtracting for better numerics on low-precision
        # inputs, then square.
        d = x_ref[...].astype(jnp.float32) - t_ref[...].astype(jnp.float32)
        d2 = d * d

        if plain:
            # Common case: every block is full and real -> unmasked accumulate.
            loss_ref[0] += reduce_to_slab(d2)
        else:
            @pl.when(blk < full_upto)
            def _():
                loss_ref[0] += reduce_to_slab(d2)

            if partial_last:
                @pl.when(blk == num_blocks - 1)
                def _():
                    # Static mask: zero rows past the end of the array.
                    rid = jax.lax.broadcasted_iota(
                        jnp.int32, (tile_rows, LANES), 0)
                    loss_ref[0] += reduce_to_slab(
                        jnp.where(rid < valid_rows_last, d2, 0.0))
            # Clamped duplicate blocks (blk >= num_blocks) contribute nothing.

    return kernel


def content_loss(x, target, *, block_bytes_per_stream=BYTES_PER_STREAM,
                 force_num_cores=None):
    """ContentLoss.forward: returns (input, mse_loss(input, target))."""
    assert x.shape == target.shape, (x.shape, target.shape)
    orig_n = x.size
    xf = x.reshape(-1)
    tf = target.reshape(-1)

    # Lane alignment WITHOUT padding copies: kernel runs on the 128-aligned
    # prefix (free reshape when numel % 128 == 0, the common conv-feature-map
    # case); the <128-element tail is added with a tiny plain-JAX sum.
    n_aligned = (orig_n // LANES) * LANES
    if n_aligned != orig_n:
        dt = xf[n_aligned:].astype(jnp.float32) - tf[n_aligned:].astype(jnp.float32)
        tail_ssd = jnp.sum(dt * dt)
    else:
        tail_ssd = jnp.float32(0.0)

    if n_aligned == 0:  # tiny input (< 128 elements): no kernel needed
        return x, tail_ssd / jnp.float32(orig_n)

    if n_aligned == orig_n:
        x2d = xf.reshape(-1, LANES)
        t2d = tf.reshape(-1, LANES)
    else:
        x2d = xf[:n_aligned].reshape(-1, LANES)
        t2d = tf[:n_aligned].reshape(-1, LANES)
    rows_total = n_aligned // LANES

    # Dtype-aware block sizing: constant BYTES per step, not rows.
    itemsize = max(x.dtype.itemsize, target.dtype.itemsize)
    tile_rows_max = max(
        SUBLANES,
        (block_bytes_per_stream // (LANES * itemsize)) // SUBLANES * SUBLANES)

    if rows_total <= tile_rows_max:
        tile_rows = _round_up(rows_total, SUBLANES)  # single (maybe partial) block
        num_blocks = 1
    else:
        tile_rows = tile_rows_max
        num_blocks = pl.cdiv(rows_total, tile_rows)

    # Megacore split only where it exists; v5e/v6e stay effectively 1-D.
    num_cores = _num_tensorcores() if force_num_cores is None else force_num_cores
    if num_blocks < num_cores:
        num_cores = 1

    # Prefer a block count that splits evenly across cores (avoids a clamped
    # duplicate block and its wasted DMA).
    if num_cores > 1 and num_blocks % num_cores != 0:
        target_nb = num_blocks + (num_cores - num_blocks % num_cores)
        tr = _round_up(pl.cdiv(rows_total, target_nb), SUBLANES)
        if SUBLANES <= tr <= tile_rows_max and pl.cdiv(rows_total, tr) == target_nb:
            tile_rows, num_blocks = tr, target_nb

    steps_per_core = pl.cdiv(num_blocks, num_cores)
    padded_blocks = num_cores * steps_per_core
    have_dupes = padded_blocks != num_blocks
    valid_rows_last = rows_total - (num_blocks - 1) * tile_rows
    last_block = num_blocks - 1

    if have_dupes:
        # Keep every DMA in-bounds; duplicated blocks are skipped in-kernel.
        def in_map(c, i):
            return (jnp.minimum(c * steps_per_core + i, last_block), 0)
    else:
        def in_map(c, i):
            return (c * steps_per_core + i, 0)

    kernel = _make_ssd_kernel(tile_rows, num_blocks, valid_rows_last, have_dupes)

    # 2 streams x 2 pipeline buffers of (tile_rows, 128) + headroom; capped at
    # 48 MiB so it stays inside v7x's 64 MiB physical VMEM.
    buf_bytes = 2 * tile_rows * LANES * (x.dtype.itemsize + target.dtype.itemsize)
    vmem_limit = max(32 * 1024 * 1024,
                     min(48 * 1024 * 1024, buf_bytes + (4 << 20)))

    partials = pl.pallas_call(
        kernel,
        out_shape=jax.ShapeDtypeStruct((num_cores, SUBLANES, LANES), jnp.float32),
        grid_spec=pltpu.PrefetchScalarGridSpec(
            num_scalar_prefetch=0,
            grid=(num_cores, steps_per_core),
            in_specs=[
                pl.BlockSpec((tile_rows, LANES), in_map),
                pl.BlockSpec((tile_rows, LANES), in_map),
            ],
            out_specs=pl.BlockSpec((1, SUBLANES, LANES), lambda c, i: (c, 0, 0)),
        ),
        compiler_params=pltpu.CompilerParams(
            dimension_semantics=("parallel", "arbitrary"),
            vmem_limit_bytes=int(vmem_limit),
        ),
    )(x2d, t2d)

    mse = (jnp.sum(partials) + tail_ssd) / jnp.float32(orig_n)
    # forward() returns its input unchanged -> no kernel traffic for it.
    return x, mse


if __name__ == "__main__":
    root = jax.random.PRNGKey(0)

    cases = [
        # (shape, dtype, kwargs) -- small shapes consistent with conv features.
        ((2, 4, 16, 16), jnp.float32, {}),                        # aligned, single block
        ((3, 5, 17, 19), jnp.float32, {}),                        # unaligned tail + partial block
        ((2, 8, 32, 32), jnp.float32,                              # multi-block reduction
         dict(block_bytes_per_stream=16 * 1024)),
        ((65, 128), jnp.float32,                                   # 2-core split, clamped dup + partial
         dict(block_bytes_per_stream=16 * 1024, force_num_cores=2)),
        ((2, 4, 16, 16), jnp.bfloat16, {}),                        # dtype-aware sizing / casts
    ]

    for idx, (shape, dtype, kw) in enumerate(cases):
        kx, kt = jax.random.split(jax.random.fold_in(root, idx))
        x = jax.random.normal(kx, shape, dtype=jnp.float32).astype(dtype)
        t = jax.random.normal(kt, shape, dtype=jnp.float32).astype(dtype)

        y, loss = content_loss(x, t, **kw)
        y, loss = jax.block_until_ready((y, loss))

        # Reference: F.mse_loss default reduction='mean' (in f32).
        ref = jnp.mean((x.astype(jnp.float32) - t.astype(jnp.float32)) ** 2)
        assert jnp.allclose(loss, ref, rtol=1e-5, atol=1e-6), (shape, dtype, loss, ref)
        assert (y is x) or jnp.array_equal(y, x), ("passthrough mismatch", shape)

    print("KERNEL_OK")
</pallas_src>

<mosaic_0001>
module attributes {stable_mosaic.version = 11 : i64} {
  func.func @kernel(%arg0: i32, %arg1: i32, %arg2: memref<16x128xf32, #tpu.memory_space<vmem>>, %arg3: memref<16x128xf32, #tpu.memory_space<vmem>>, %arg4: memref<1x8x128xf32, #tpu.memory_space<vmem>>) attributes {dimension_semantics = [#tpu.dimension_semantics<parallel>, #tpu.dimension_semantics<arbitrary>], iteration_bounds = array<i64: 1, 1>, scalar_prefetch = 0 : i64, scratch_operands = 0 : i64, tpu.core_type = #tpu.core_type<tc>, window_params = [{transform_indices = @transform_0, window_bounds = array<i64: 16, 128>}, {transform_indices = @transform_1, window_bounds = array<i64: 16, 128>}, {transform_indices = @transform_2, window_bounds = array<i64: 1, 8, 128>}]} {
    %c0_i32 = arith.constant 0 : i32
    %0 = arith.cmpi eq, %arg1, %c0_i32 : i32
    %1 = arith.extui %0 : i1 to i32
    %c0_i32_0 = arith.constant 0 : i32
    %2 = arith.cmpi ne, %1, %c0_i32_0 : i32
    scf.if %2 {
      %cst_10 = arith.constant 0.000000e+00 : f32
      %15 = vector.broadcast %cst_10 : f32 to vector<8x128xf32>
      %c0_11 = arith.constant 0 : index
      %c0_12 = arith.constant 0 : index
      %c0_13 = arith.constant 0 : index
      %16 = vector.load %arg4[%c0_11, %c0_12, %c0_13] : memref<1x8x128xf32, #tpu.memory_space<vmem>>, vector<1x8x128xf32>
      %17 = vector.shape_cast %16 : vector<1x8x128xf32> to vector<8x128xf32>
      %18 = vector.shape_cast %15 : vector<8x128xf32> to vector<1x8x128xf32>
      tpu.vector_store %arg4[%c0_11, %c0_12, %c0_13], %18 {strides = array<i32>} : memref<1x8x128xf32, #tpu.memory_space<vmem>>, vector<1x8x128xf32>,
    } else {
    }
    %c0 = arith.constant 0 : index
    %c0_1 = arith.constant 0 : index
    %3 = vector.load %arg2[%c0, %c0_1] : memref<16x128xf32, #tpu.memory_space<vmem>>, vector<16x128xf32>
    %c0_2 = arith.constant 0 : index
    %c0_3 = arith.constant 0 : index
    %4 = vector.load %arg3[%c0_2, %c0_3] : memref<16x128xf32, #tpu.memory_space<vmem>>, vector<16x128xf32>
    %5 = arith.subf %3, %4 : vector<16x128xf32>
    %6 = arith.mulf %5, %5 : vector<16x128xf32>
    %c0_4 = arith.constant 0 : index
    %c0_5 = arith.constant 0 : index
    %c0_6 = arith.constant 0 : index
    %7 = vector.load %arg4[%c0_4, %c0_5, %c0_6] : memref<1x8x128xf32, #tpu.memory_space<vmem>>, vector<1x8x128xf32>
    %8 = vector.shape_cast %7 : vector<1x8x128xf32> to vector<8x128xf32>
    %9 = vector.shape_cast %6 : vector<16x128xf32> to vector<2x8x128xf32>
    %cst = arith.constant dense<0.000000e+00> : vector<8x128xf32>
    %10 = vector.multi_reduction <add>, %9, %cst [0] : vector<2x8x128xf32> to vector<8x128xf32>
    %11 = arith.addf %8, %10 : vector<8x128xf32>
    %c0_7 = arith.constant 0 : index
    %c0_8 = arith.constant 0 : index
    %c0_9 = arith.constant 0 : index
    %12 = vector.load %arg4[%c0_7, %c0_8, %c0_9] : memref<1x8x128xf32, #tpu.memory_space<vmem>>, vector<1x8x128xf32>
    %13 = vector.shape_cast %12 : vector<1x8x128xf32> to vector<8x128xf32>
    %14 = vector.shape_cast %11 : vector<8x128xf32> to vector<1x8x128xf32>
    tpu.vector_store %arg4[%c0_7, %c0_8, %c0_9], %14 {strides = array<i32>} : memref<1x8x128xf32, #tpu.memory_space<vmem>>, vector<1x8x128xf32>,
    return
  }
  func.func @transform_0(%arg0: i32, %arg1: i32) -> (i32, i32) {
    %c1_i32 = arith.constant 1 : i32
    %0 = arith.muli %arg0, %c1_i32 : i32
    %1 = arith.addi %0, %arg1 : i32
    %c0_i32 = arith.constant 0 : i32
    %c0_i32_0 = arith.constant 0 : i32
    return %1, %c0_i32 : i32, i32
  }
  func.func @transform_1(%arg0: i32, %arg1: i32) -> (i32, i32) {
    %c1_i32 = arith.constant 1 : i32
    %0 = arith.muli %arg0, %c1_i32 : i32
    %1 = arith.addi %0, %arg1 : i32
    %c0_i32 = arith.constant 0 : i32
    %c0_i32_0 = arith.constant 0 : i32
    return %1, %c0_i32 : i32, i32
  }
  func.func @transform_2(%arg0: i32, %arg1: i32) -> (i32, i32, i32) {
    %c0_i32 = arith.constant 0 : i32
    %c0_i32_0 = arith.constant 0 : i32
    %c0_i32_1 = arith.constant 0 : i32
    return %arg0, %c0_i32, %c0_i32_0 : i32, i32, i32
  }
}

</mosaic_0001>

<bundles_post_ra>
// kernel: tpu_custom_call.1
= control target key start
LH: loop header
LB: loop body
LE: loop exit
PB: predicated region body
PF: predicated region fallthrough
CT: control target
= control target key end

     0   :  { %7 = vsyncpa [#allocation3], 0  ;;  %s204_s0 = inlined_call_operand.hbm [shape: f32[16,128], index: 0, kind: input, shape index: {}]   ;;  %s205_s1 = inlined_call_operand.hbm [shape: f32[16,128], index: 1, kind: input, shape index: {}]   ;;  %s206_s2 = inlined_call_operand.hbm [shape: f32[1,8,128], index: 2, kind: output, shape index: {}]  }
   0x1   :  { %8 = vsyncpa [#allocation6], 0 }
   0x2   :  { %9 = vsyncpa [#allocation4], 0  ;;  %s18_s11 = sshll.u32 %s204_s0, 4  ;;  %s175_s12 = smov [#allocation2]   ;;  %s19_s11 = int_to_ptr.hbm [resolvable:$true] %s18_s11 }
   0x3   :  { %s20_s13 = sshll.u32 %s175_s12, 4  ;;  %s35_s16 = sshll.u32 %s205_s1, 4  ;;  %s21_s13 = int_to_ptr.vmem [resolvable:$true] %s20_s13  ;;  %s36_s16 = int_to_ptr.hbm [resolvable:$true] %s35_s16 }
   0x4   :  { %s176_s17 = smov 128   ;;  %s177_s18 = smov 8  }
   0x5   :  { %26 = dma.hbm_to_vmem [thread:$0]  %s19_s11, 256, %s21_s13, [#allocation3], %s176_s17, %s176_s17, %s177_s18  }
   0x6   :  { %s178_s19 = smov [#allocation5]  }
   0x7   :  { %s37_s20 = sshll.u32 %s178_s19, 4  ;;  %s38_s20 = int_to_ptr.vmem [resolvable:$true] %s37_s20 }
   0x8   :  { %43 = dma.hbm_to_vmem [thread:$0]  %s36_s16, 256, %s38_s20, [#allocation6], %s176_s17, %s176_s17, %s177_s18  }
   0x9   :  { %169 = dma.done.wait [#allocation3], 256  }
   0xa   :  { %170 = vsyncadd [#allocation3], 4294967040 }
   0xb   :  { %171 = dma.done.wait [#allocation6], 256  }
   0xc   :  { %172 = vsyncadd [#allocation6], 4294967040  ;;  %v61_v0 = vld [vmem:[#allocation2] sm:$0xff]  ;;  %v62_v1 = vld [vmem:[#allocation2 + $0x8] sm:$0xff]  ;;  %s179_s0 = smov [#allocation7]   ;;  %s80_s23 = sshll.u32 %s206_s2, 4  ;;  %s81_s23 = int_to_ptr.hbm [resolvable:$true] %s80_s23 }
   0xd   :  { %v63_v2 = vld [vmem:[#allocation5] sm:$0xff]  ;;  %v64_v3 = vld [vmem:[#allocation5 + $0x8] sm:$0xff]  ;;  %s78_s1 = sshll.u32 %s179_s0, 4  ;;  %s79_s1 = int_to_ptr.vmem [resolvable:$true] %s78_s1 }
   0xe   :  { %v65_v4 = vsub.f32 %v61_v0, %v63_v2  ;;  %v66_v5 = vsub.f32 %v62_v1, %v64_v3 }
  0x10   :  { %v67_v6 = vmul.f32 %v65_v4, %v65_v4  ;;  %v68_v7 = vmul.f32 %v66_v5, %v66_v5 }
  0x12   :  { %v70_v8 = vadd.f32 %v68_v7, %v67_v6 }
  0x14   :  { %72 = vst [vmem:[#allocation7] sm:$0xff] %v70_v8 }
  0x15   :  { %83 = dma.vmem_to_hbm [thread:$0]  %s79_s1, 128, %s81_s23, [#allocation4]  }
  0x16   :  { %173 = dma.done.wait [#allocation4], 128  }
  0x17   :  { %174 = vsyncadd [#allocation4], 4294967168 }
  0x18   :  { %88 = vsyncpa [#allocation3], 1 }
  0x19   :  { %89 = vsyncpa [#allocation6], 1 }
  0x1a   :  { %90 = vsyncpa [#allocation4], 1 }

</bundles_post_ra>
